<compile_context>
chip_gen: v7x
topology: tpu7x:2x2x1
jax: 0.10.0
libtpu: 0.0.40
codegen_flags: <defaults>
</compile_context>

<pallas_src>
import functools

import jax
import jax.numpy as jnp
from jax import lax
from jax.experimental import pallas as pl
from jax.experimental.pallas import tpu as pltpu


def _round_up(x, m):
    return ((x + m - 1) // m) * m


def _cdiv(a, b):
    return (a + b - 1) // b


# Scoped VMEM limit and per-grid-step working-set budget.  The working set is
# sized on the f32 temporaries (upcast copy, exp, weight/select) plus the
# double-buffered input-dtype tile, so the same numbers are safe on
# v5e/v6e (128 MiB physical VMEM) and v7x (64 MiB physical VMEM).
_VMEM_LIMIT_BYTES = 48 * 1024 * 1024
_WORKING_SET_BUDGET = 24 * 1024 * 1024


def _per_batch_elem_bytes(num_classes, itemsize):
    # 2x input dtype (double-buffered DMA) + ~4 f32-sized (tile, C) temporaries.
    return num_classes * (2 * itemsize + 16)


def _pick_rows_rowmajor(batch, num_classes, itemsize):
    """Batch rows per tile for the row-major (B, C) layout (large C)."""
    sub = 8 * max(1, 4 // max(1, itemsize))          # sublane granularity
    rows = _WORKING_SET_BUDGET // _per_batch_elem_bytes(num_classes, itemsize)
    rows = max(sub, (rows // sub) * sub)
    # Aim for >= 2 grid steps when B allows: keeps both v7x TensorCores busy
    # and lets the BlockSpec pipeline overlap DMA with compute.
    rows = min(rows, max(sub, _round_up(_cdiv(batch, 2), sub)))
    return int(rows)


def _pick_cols_classmajor(batch, num_classes, itemsize):
    """Batch columns (lane axis) per tile for the class-major (C, B) layout."""
    if batch <= 128:
        return int(batch)                            # single full-extent tile
    cols = _WORKING_SET_BUDGET // _per_batch_elem_bytes(num_classes, itemsize)
    cols = max(128, (cols // 128) * 128)
    cols = min(cols, max(128, _round_up(_cdiv(batch, 2), 128)))
    return int(cols)


def _ce_ls_rowmajor_kernel(x_ref, tgt_ref, out_ref, *, num_classes, epsilon,
                           true_batch, block_rows):
    """Logits tile (TB, C); targets tile (TB, 1).  Used for larger C."""
    i = pl.program_id(0)
    x_in = x_ref[...]                                     # (TB, C) input dtype
    tgt = tgt_ref[...]                                    # (TB, 1) int32
    tb, c = x_in.shape

    # Row max in the input dtype (exact for bf16), everything else in f32.
    m = jnp.max(x_in, axis=1, keepdims=True).astype(jnp.float32)        # (TB,1)
    x = x_in.astype(jnp.float32)
    lse = m + jnp.log(jnp.sum(jnp.exp(x - m), axis=1, keepdims=True))   # (TB,1)

    # Fused smoothed-target reduction: loss_b = lse_b - sum_c w_c * x_{b,c}.
    class_ids = lax.broadcasted_iota(jnp.int32, (tb, c), 1)
    w_on = jnp.float32(1.0 - epsilon + epsilon / num_classes)
    w_off = jnp.float32(epsilon / num_classes)
    wsum = jnp.sum(jnp.where(class_ids == tgt, w_on, w_off) * x,
                   axis=1, keepdims=True)                               # (TB,1)
    per_row = lse - wsum

    # Padded rows of the last tile hold undefined data (possible inf/NaN);
    # select 0.0 by value (do NOT replace with a multiply-by-mask).
    row_ids = i * block_rows + lax.broadcasted_iota(jnp.int32, (tb, 1), 0)
    per_row = jnp.where(row_ids < true_batch, per_row, 0.0)

    # Lane-dense, unmasked store; the wrapper reads [:, 0, 0].
    out_ref[...] = jnp.full((1, 8, 128), jnp.sum(per_row), dtype=jnp.float32)


def _ce_ls_classmajor_kernel(xT_ref, tgt_ref, out_ref, *, num_classes, epsilon,
                             true_batch, block_cols):
    """Logits tile (C, TB) with batch on the lane axis; targets tile (1, TB)."""
    i = pl.program_id(0)
    x_in = xT_ref[...]                                    # (C, TB) input dtype
    tgt = tgt_ref[...]                                    # (1, TB) int32
    c, tb = x_in.shape

    m = jnp.max(x_in, axis=0, keepdims=True).astype(jnp.float32)        # (1,TB)
    x = x_in.astype(jnp.float32)
    lse = m + jnp.log(jnp.sum(jnp.exp(x - m), axis=0, keepdims=True))   # (1,TB)

    class_ids = lax.broadcasted_iota(jnp.int32, (c, tb), 0)
    w_on = jnp.float32(1.0 - epsilon + epsilon / num_classes)
    w_off = jnp.float32(epsilon / num_classes)
    wsum = jnp.sum(jnp.where(class_ids == tgt, w_on, w_off) * x,
                   axis=0, keepdims=True)                               # (1,TB)
    per_col = lse - wsum

    # Mask batch columns padded in by the last partial tile (NaN-safe select).
    col_ids = i * block_cols + lax.broadcasted_iota(jnp.int32, (1, tb), 1)
    per_col = jnp.where(col_ids < true_batch, per_col, 0.0)

    out_ref[...] = jnp.full((1, 8, 128), jnp.sum(per_col), dtype=jnp.float32)


def cross_entropy_label_smooth(inputs, targets, *, num_classes, epsilon,
                               block_rows=None, class_major=None):
    """inputs: (B, C) float logits (f32/bf16); targets: (B,) int class indices."""
    B, C = inputs.shape
    assert C == num_classes
    tgt = targets.astype(jnp.int32)
    itemsize = inputs.dtype.itemsize

    if class_major is None:
        class_major = C <= 32   # small-C: put the batch on the 128-lane axis

    params = pltpu.CompilerParams(
        dimension_semantics=("parallel",),
        vmem_limit_bytes=_VMEM_LIMIT_BYTES,
    )

    if class_major:
        tb = int(block_rows) if block_rows is not None else _pick_cols_classmajor(B, C, itemsize)
        num_tiles = _cdiv(B, tb)
        kernel = functools.partial(
            _ce_ls_classmajor_kernel, num_classes=num_classes,
            epsilon=float(epsilon), true_batch=B, block_cols=tb)
        xT = inputs.T                       # (C, B): batch along lanes
        tgt2d = tgt.reshape(1, B)
        partials = pl.pallas_call(
            kernel,
            out_shape=jax.ShapeDtypeStruct((num_tiles, 8, 128), jnp.float32),
            grid=(num_tiles,),
            in_specs=[
                pl.BlockSpec((C, tb), lambda i: (0, i)),   # logits tile -> VMEM
                pl.BlockSpec((1, tb), lambda i: (0, i)),   # targets     -> VMEM
            ],
            out_specs=pl.BlockSpec((1, 8, 128), lambda i: (i, 0, 0)),
            compiler_params=params,
        )(xT, tgt2d)
    else:
        # TODO(synk): vocab-scale C (32k+) would want a second streaming
        # (logsumexp) grid axis over classes; here the class axis is one block.
        tb = int(block_rows) if block_rows is not None else _pick_rows_rowmajor(B, C, itemsize)
        num_tiles = _cdiv(B, tb)
        kernel = functools.partial(
            _ce_ls_rowmajor_kernel, num_classes=num_classes,
            epsilon=float(epsilon), true_batch=B, block_rows=tb)
        tgt2d = tgt.reshape(B, 1)
        partials = pl.pallas_call(
            kernel,
            out_shape=jax.ShapeDtypeStruct((num_tiles, 8, 128), jnp.float32),
            grid=(num_tiles,),
            in_specs=[
                pl.BlockSpec((tb, C), lambda i: (i, 0)),   # logits tile -> VMEM
                pl.BlockSpec((tb, 1), lambda i: (i, 0)),   # targets     -> VMEM
            ],
            out_specs=pl.BlockSpec((1, 8, 128), lambda i: (i, 0, 0)),
            compiler_params=params,
        )(inputs, tgt2d)

    return jnp.sum(partials[:, 0, 0]) / jnp.float32(B)


def _reference(inputs, targets, num_classes, epsilon):
    # Pure-JAX reference mirroring the PyTorch forward.
    log_probs = jax.nn.log_softmax(inputs.astype(jnp.float32), axis=1)
    onehot = jax.nn.one_hot(targets, num_classes, dtype=jnp.float32)
    smooth = (1.0 - epsilon) * onehot + epsilon / num_classes
    return (-smooth * log_probs).mean(0).sum()


if __name__ == "__main__":
    epsilon = 0.1
    key = jax.random.PRNGKey(0)

    # Check 1: small f32 case, C<=32 -> class-major path, single full tile.
    num_classes = 16
    batch = 8
    kx, kt = jax.random.split(key)
    inputs = jax.random.normal(kx, (batch, num_classes), dtype=jnp.float32)
    targets = jax.random.randint(kt, (batch,), 0, num_classes, dtype=jnp.int32)
    loss = jax.block_until_ready(
        cross_entropy_label_smooth(inputs, targets,
                                   num_classes=num_classes, epsilon=epsilon))
    ref = _reference(inputs, targets, num_classes, epsilon)
    assert jnp.allclose(loss, ref, rtol=1e-5, atol=1e-5), (loss, ref)

    # Check 2: class-major multi-tile grid with a padded last tile
    # (exercises lane masking and the "parallel" batch axis).
    batch2 = 200
    kx2, kt2 = jax.random.split(jax.random.PRNGKey(1))
    inputs2 = jax.random.normal(kx2, (batch2, num_classes), dtype=jnp.float32)
    targets2 = jax.random.randint(kt2, (batch2,), 0, num_classes, dtype=jnp.int32)
    loss2 = jax.block_until_ready(
        cross_entropy_label_smooth(inputs2, targets2, num_classes=num_classes,
                                   epsilon=epsilon, block_rows=128))
    ref2 = _reference(inputs2, targets2, num_classes, epsilon)
    assert jnp.allclose(loss2, ref2, rtol=1e-5, atol=1e-5), (loss2, ref2)

    # Check 3: larger C -> row-major path, multi-tile with padded last rows.
    num_classes3 = 40
    batch3 = 12
    kx3, kt3 = jax.random.split(jax.random.PRNGKey(2))
    inputs3 = jax.random.normal(kx3, (batch3, num_classes3), dtype=jnp.float32)
    targets3 = jax.random.randint(kt3, (batch3,), 0, num_classes3, dtype=jnp.int32)
    loss3 = jax.block_until_ready(
        cross_entropy_label_smooth(inputs3, targets3, num_classes=num_classes3,
                                   epsilon=epsilon, block_rows=8))
    ref3 = _reference(inputs3, targets3, num_classes3, epsilon)
    assert jnp.allclose(loss3, ref3, rtol=1e-5, atol=1e-5), (loss3, ref3)

    # Check 4: bf16 logits (input-dtype max, f32 exp/log/accumulation).
    batch4 = 16
    kx4, kt4 = jax.random.split(jax.random.PRNGKey(3))
    inputs4 = jax.random.normal(kx4, (batch4, num_classes),
                                dtype=jnp.float32).astype(jnp.bfloat16)
    targets4 = jax.random.randint(kt4, (batch4,), 0, num_classes, dtype=jnp.int32)
    loss4 = jax.block_until_ready(
        cross_entropy_label_smooth(inputs4, targets4,
                                   num_classes=num_classes, epsilon=epsilon))
    ref4 = _reference(inputs4, targets4, num_classes, epsilon)
    assert jnp.allclose(loss4, ref4, rtol=1e-4, atol=1e-4), (loss4, ref4)

    print("KERNEL_OK")
</pallas_src>

<mosaic_0001>
module attributes {stable_mosaic.version = 11 : i64} {
  func.func @_ce_ls_classmajor_kernel(%arg0: i32, %arg1: memref<16x8xf32, #tpu.memory_space<vmem>>, %arg2: memref<1x8xi32, #tpu.memory_space<vmem>>, %arg3: memref<1x8x128xf32, #tpu.memory_space<vmem>>) attributes {dimension_semantics = [#tpu.dimension_semantics<parallel>], iteration_bounds = array<i64: 1>, scalar_prefetch = 0 : i64, scratch_operands = 0 : i64, tpu.core_type = #tpu.core_type<tc>, window_params = [{transform_indices = @transform_0, window_bounds = array<i64: 16, 8>}, {transform_indices = @transform_1, window_bounds = array<i64: 1, 8>}, {transform_indices = @transform_2, window_bounds = array<i64: 1, 8, 128>}]} {
    %c0 = arith.constant 0 : index
    %c0_0 = arith.constant 0 : index
    %0 = vector.load %arg1[%c0, %c0_0] : memref<16x8xf32, #tpu.memory_space<vmem>>, vector<16x8xf32>
    %c0_1 = arith.constant 0 : index
    %c0_2 = arith.constant 0 : index
    %1 = vector.load %arg2[%c0_1, %c0_2] : memref<1x8xi32, #tpu.memory_space<vmem>>, vector<1x8xi32>
    %cst = arith.constant dense<0xFF800000> : vector<8xf32>
    %2 = vector.multi_reduction <maximumf>, %0, %cst [0] : vector<16x8xf32> to vector<8xf32>
    %3 = vector.shape_cast %2 : vector<8xf32> to vector<1x8xf32>
    %4 = vector.broadcast %3 : vector<1x8xf32> to vector<16x8xf32>
    %5 = arith.subf %0, %4 : vector<16x8xf32>
    %6 = math.exp %5 : vector<16x8xf32>
    %cst_3 = arith.constant dense<0.000000e+00> : vector<8xf32>
    %7 = vector.multi_reduction <add>, %6, %cst_3 [0] : vector<16x8xf32> to vector<8xf32>
    %8 = vector.shape_cast %7 : vector<8xf32> to vector<1x8xf32>
    %9 = math.log %8 : vector<1x8xf32>
    %10 = arith.addf %3, %9 : vector<1x8xf32>
    %11 = tpu.iota {dimensions = array<i32: 0>} : vector<16x8xi32>
    %12 = vector.broadcast %1 : vector<1x8xi32> to vector<16x8xi32>
    %13 = arith.cmpi eq, %11, %12 : vector<16x8xi32>
    %cst_4 = arith.constant 9.062500e-01 : f32
    %cst_5 = arith.constant 6.250000e-03 : f32
    %14 = vector.broadcast %cst_4 : f32 to vector<16x8xf32>
    %15 = vector.broadcast %cst_5 : f32 to vector<16x8xf32>
    %16 = arith.select %13, %14, %15 : vector<16x8xi1>, vector<16x8xf32>
    %17 = arith.mulf %16, %0 : vector<16x8xf32>
    %cst_6 = arith.constant dense<0.000000e+00> : vector<8xf32>
    %18 = vector.multi_reduction <add>, %17, %cst_6 [0] : vector<16x8xf32> to vector<8xf32>
    %19 = vector.shape_cast %18 : vector<8xf32> to vector<1x8xf32>
    %20 = arith.subf %10, %19 : vector<1x8xf32>
    %c8_i32 = arith.constant 8 : i32
    %21 = arith.muli %arg0, %c8_i32 : i32
    %22 = tpu.iota {dimensions = array<i32: 1>} : vector<1x8xi32>
    %23 = vector.broadcast %21 : i32 to vector<1x8xi32>
    %24 = arith.addi %23, %22 : vector<1x8xi32>
    %c8_i32_7 = arith.constant 8 : i32
    %25 = vector.broadcast %c8_i32_7 : i32 to vector<1x8xi32>
    %26 = arith.cmpi slt, %24, %25 : vector<1x8xi32>
    %cst_8 = arith.constant 0.000000e+00 : f32
    %27 = vector.broadcast %cst_8 : f32 to vector<1x8xf32>
    %28 = arith.select %26, %20, %27 : vector<1x8xi1>, vector<1x8xf32>
    %29 = vector.shape_cast %28 : vector<1x8xf32> to vector<1x1x8xf32>
    %cst_9 = arith.constant dense<0.000000e+00> : vector<1xf32>
    %30 = vector.multi_reduction <add>, %29, %cst_9 [1, 2] : vector<1x1x8xf32> to vector<1xf32>
    %31 = vector.shape_cast %30 : vector<1xf32> to vector<1x1x1xf32>
    %32 = vector.extract %31[0, 0, 0] : f32 from vector<1x1x1xf32>
    %33 = vector.broadcast %32 : f32 to vector<1x8x128xf32>
    %c0_10 = arith.constant 0 : index
    %c0_11 = arith.constant 0 : index
    %c0_12 = arith.constant 0 : index
    %34 = vector.load %arg3[%c0_10, %c0_11, %c0_12] : memref<1x8x128xf32, #tpu.memory_space<vmem>>, vector<1x8x128xf32>
    tpu.vector_store %arg3[%c0_10, %c0_11, %c0_12], %33 {strides = array<i32>} : memref<1x8x128xf32, #tpu.memory_space<vmem>>, vector<1x8x128xf32>,
    return
  }
  func.func @transform_0(%arg0: i32) -> (i32, i32) {
    %c0_i32 = arith.constant 0 : i32
    %c0_i32_0 = arith.constant 0 : i32
    return %c0_i32, %arg0 : i32, i32
  }
  func.func @transform_1(%arg0: i32) -> (i32, i32) {
    %c0_i32 = arith.constant 0 : i32
    %c0_i32_0 = arith.constant 0 : i32
    return %c0_i32, %arg0 : i32, i32
  }
  func.func @transform_2(%arg0: i32) -> (i32, i32, i32) {
    %c0_i32 = arith.constant 0 : i32
    %c0_i32_0 = arith.constant 0 : i32
    %c0_i32_1 = arith.constant 0 : i32
    return %arg0, %c0_i32, %c0_i32_0 : i32, i32, i32
  }
}

</mosaic_0001>

<bundles_post_ra>
// kernel: tpu_custom_call.1
= control target key start
LH: loop header
LB: loop body
LE: loop exit
PB: predicated region body
PF: predicated region fallthrough
CT: control target
= control target key end

     0   :  { %vm15_vm0 = vcmask 64512   ;;  %s179_s0 = inlined_call_operand.vmem [shape: f32[16,8], index: 0, kind: input, shape index: {}]   ;;  %s180_s1 = inlined_call_operand.vmem [shape: s32[1,8], index: 1, kind: input, shape index: {}]   ;;  %s181_s2 = inlined_call_operand.hbm [shape: f32[1,8,128], index: 2, kind: output, shape index: {}]  }
   0x1   :  { %v12_v0 = vld [vmem:[%s179_s0] sm:$0xff]  ;;  %v13_v1 = vld [vmem:[%s179_s0 + $0x8] sm:$0xff] }
   0x2   :  { %v16_v2 = vsel %vm15_vm0, %v12_v0, -inf  ;;  %v17_v3 = vsel %vm15_vm0, %v13_v1, -inf }
   0x3   :  { %7 = vsyncpa [#allocation3], 0  ;;  %v18_v4 = vmax.f32 %v16_v2, %v17_v3  ;;  %v43_v8 = vlaneseq  ;;  %v100_v16 = vld [vmem:[%s180_s1] ss:$0 sm:$0xff]  ;;  %v135_v19 = vmov 0.00625  }
   0x4   :  { %vm73_vm4 = vcmask 57344   ;;  %s136_s1 = smov [#allocation2]  }
   0x5   :  { %v19_v5 = vrot.slane %v18_v4, 4  ;;  %v44_v11 = vshrl.u32 %v43_v8, 7  ;;  %v68_v44 = vand.u32 127, %v43_v8  ;;  %s92_s14 = sshll.u32 %s136_s1, 4  ;;  %s93_s14 = int_to_ptr.vmem [resolvable:$true] %s92_s14 }
   0x6   :  { %s111_s16 = scalar_lea.vmem %s93_s14, 128  ;;  %p116_p1 = scmp.lt.s32.totalorder %s93_s14, %s93_s14 }
   0x7   :  { %v20_v6 = vmax.f32 %v18_v4, %v19_v5  ;;  %v45_v15 = vadd.s32 8, %v44_v11  ;;  %vm50_vm1 = vcmp.eq.s32.totalorder %v44_v11, %v100_v16  ;;  %vm71_vm3 = vcmp.lt.s32.totalorder %v68_v44, 8  ;;  %p112_p0 = scmp.ne.s32.totalorder %s93_s14, %s111_s16  ;;  %p117_p2 = scmp.lt.s32.totalorder %s111_s16, %s111_s16 }
   0x8   :  { %v52_v20 = vsel %vm50_vm1, 0.90625, %v135_v19 }
   0x9   :  { %v21_v7 = vrot.slane %v20_v6, 2  ;;  %vm51_vm2 = vcmp.eq.s32.totalorder %v45_v15, %v100_v16  ;;  %v54_v22 = vmul.f32 %v52_v20, %v12_v0  ;;  %p118_p3 = por %p117_p2, %p116_p1 }
   0xa   :  { %v53_v21 = vsel %vm51_vm2, 0.90625, %v135_v19 }
   0xb   :  { %v22_v9 = vmax.f32 %v20_v6, %v21_v7  ;;  %v55_v23 = vmul.f32 %v53_v21, %v13_v1  ;;  %v56_v27 = vsel %vm15_vm0, %v54_v22, 0.0  ;;  %p119_p4 = pnand %p118_p3, %p112_p0 }
   0xd   :  { %v23_v10 = vrot.slane %v22_v9, 1  ;;  %v57_v28 = vsel %vm15_vm0, %v55_v23, 0.0 }
   0xe   :  { %v58_v31 = vadd.f32 %v57_v28, %v56_v27 }
   0xf   :  { %v24_v12 = vmax.f32 %v22_v9, %v23_v10 }
  0x10   :  { %v59_v34 = vrot.slane %v58_v31, 4 }
  0x11   :  { %v25_v13 = vsub.f32 %v12_v0, %v24_v12  ;;  %v26_v14 = vsub.f32 %v13_v1, %v24_v12 }
  0x12   :  { %v60_v37 = vadd.f32 %v59_v34, %v58_v31 }
  0x13   :  { %v27_v17 = vmul.f32 1.442695, %v25_v13  ;;  %v29_v18 = vmul.f32 1.442695, %v26_v14 }
  0x14   :  { %v61_v40 = vrot.slane %v60_v37, 2 }
  0x15   :  { %105 = vpow2.f32 %v27_v17 }
  0x16   :  { %107 = vpow2.f32 %v29_v18  ;;  %v62_v41 = vadd.f32 %v61_v40, %v60_v37 }
  0x18   :  { %v63_v42 = vrot.slane %v62_v41, 1 }
  0x1a   :  { %v64_v46 = vadd.f32 %v63_v42, %v62_v41 }
  0x1f   :  { %v106_v24 = vpop.eup %105 }
  0x20   :  { %v108_v25 = vpop.eup %107  ;;  %v31_v26 = vsel %vm15_vm0, %v106_v24, 0.0 }
  0x21   :  { %v32_v29 = vsel %vm15_vm0, %v108_v25, 0.0 }
  0x22   :  { %v33_v30 = vadd.f32 %v32_v29, %v31_v26 }
  0x24   :  { %v34_v32 = vrot.slane %v33_v30, 4 }
  0x26   :  { %v35_v33 = vadd.f32 %v34_v32, %v33_v30 }
  0x28   :  { %v36_v35 = vrot.slane %v35_v33, 2 }
  0x2a   :  { %v37_v36 = vadd.f32 %v36_v35, %v35_v33 }
  0x2c   :  { %v38_v38 = vrot.slane %v37_v36, 1 }
  0x2e   :  { %v39_v39 = vadd.f32 %v38_v38, %v37_v36 }
  0x30   :  { %109 = vlog2.f32 %v39_v39 }
  0x3a   :  { %v110_v43 = vpop.eup %109 }
  0x3b   :  { %v41_v45 = vmul.f32 0.6931472, %v110_v43 }
  0x3d   :  { %v42_v47 = vadd.f32 %v41_v45, %v24_v12 }
  0x3f   :  { %v65_v48 = vsub.f32 %v42_v47, %v64_v46 }
  0x41   :  { %v72_v49 = vsel %vm71_vm3, %v65_v48, 0.0 }
  0x42   :  { %v74_v50 = vsel %vm73_vm4, %v72_v49, 0.0 }
  0x43   :  { %75 = vadd.xlane.f32.xlu0 %v74_v50 }
  0xd0   :  { %v76_v51 = vpop.xlane.xlu0 %75 }
  0xd1   :  { %v77_v52 = vrot.slane %v76_v51, 4 }
  0xd3   :  { %v78_v53 = vadd.f32 %v77_v52, %v76_v51 }
  0xd5   :  { %v79_v54 = vrot.slane %v78_v53, 2 }
  0xd7   :  { %v80_v55 = vadd.f32 %v79_v54, %v78_v53 }
  0xd9   :  { %v81_v56 = vrot.slane %v80_v55, 1 }
  0xdb   :  { %v82_v57 = vadd.f32 %v81_v56, %v80_v55 }
  0xdd   :  { %101 = vpush %v82_v57 }
 0x10e   :  { %s102_s15 = spop %101 }
 0x10f   :  { %v84_v58 = vstv %s102_s15 }
 0x110   :  { %85 = vst [vmem:[#allocation2] sm:$0xff] %v84_v58 }
 0x111   :  { %122 = shalt.err (!%p119_p4)
}
 0x112   :  { %s123_s19 = scalar_lea.hbm %s181_s2, 128 }
 0x113   :  { %p124_p5 = scmp.ne.s32.totalorder %s181_s2, %s123_s19  ;;  %p127_p6 = scmp.lt.u32.totalorder %s123_s19, %s181_s2 }
 0x115   :  { %p129_p7 = pnand %p127_p6, %p124_p5 }
 0x117   :  { %132 = shalt.err (!%p129_p7)
}
 0x118   :  { %95 = dma.vmem_to_hbm [thread:$0]  %s93_s14, 128, %s181_s2, [#allocation3]  }
 0x119   :  { %133 = dma.done.wait [#allocation3], 128  }
 0x11a   :  { %134 = vsyncadd [#allocation3], 4294967168 }
 0x11b   :  { %99 = vsyncpa [#allocation3], 1 }

</bundles_post_ra>
